<compile_context>
chip_gen: v5e
topology: v5e:2x2
jax: 0.10.0
libtpu: 0.0.40
codegen_flags: <defaults>
</compile_context>

<pallas_src>
import jax
import jax.numpy as jnp
from jax.experimental import pallas as pl
from jax.experimental.pallas import tpu as pltpu


# --------------------------------------------------------------------------------------
# Generation-aware tiling / VMEM budget
# --------------------------------------------------------------------------------------
def _tpu_generation():
    """Best-effort TPU generation detection (5, 6, 7, ...). Defaults to 6."""
    try:
        kind = jax.devices()[0].device_kind.lower()
    except Exception:  # pragma: no cover - CPU/interpret fallback
        kind = ""
    for g in (7, 6, 5, 4):
        if f"v{g}" in kind:
            return g
    return 6


def _tuning_for_generation(gen):
    if gen >= 7:
        # v7x: 64 MiB physical VMEM -> keep explicit headroom; 256-wide MXU.
        return 256, 48 * 1024 * 1024
    if gen == 6:
        # v6e: 128 MiB physical VMEM; 2x256x256 MXU -> tq=256 fills the M dim.
        return 256, 96 * 1024 * 1024
    # v5e (and older): 4x128x128 MXU, M=128 already saturates it; 128 MiB VMEM.
    return 128, 96 * 1024 * 1024


# --------------------------------------------------------------------------------------
# Kernel 1: node projection  Wh = h @ W  and attention scalars s = Wh @ [a1 a2]
# --------------------------------------------------------------------------------------
def gat_project_kernel(h_ref, w_ref, amat_ref, wh_ref, s_ref):
    # bf16 operands, f32 accumulation on the MXU.
    wh_f32 = jnp.dot(
        h_ref[...].astype(jnp.bfloat16),
        w_ref[...].astype(jnp.bfloat16),
        preferred_element_type=jnp.float32,
    )  # (TQ, F_out) f32
    # Per-node logit scalars on the MXU (instead of VPU mul + XLU lane reduction):
    #   s[:, 0] = Wh @ a1,  s[:, 1] = Wh @ a2
    s_ref[...] = jnp.dot(wh_f32, amat_ref[...], preferred_element_type=jnp.float32)
    wh_ref[...] = wh_f32.astype(wh_ref.dtype)  # store bf16 values for the second matmul


# --------------------------------------------------------------------------------------
# Kernel 2: masked-softmax attention + aggregation, one row block of nodes per grid step
# --------------------------------------------------------------------------------------
def gat_attention_kernel(adj_ref, s1_ref, s2_ref, wh_ref, out_ref):
    # logits: e[i, j] = leakyrelu(s1[i] + s2[j]); s2 arrives lane-dense -> no transpose.
    e = s1_ref[...] + s2_ref[...]                         # (TQ, 1)+(1, N) -> (TQ, N) f32
    e = jnp.maximum(e, 0.01 * e)                          # LeakyReLU(0.01), mul+max only

    # adjacency mask: compare the int8 block directly (no i32 widening / extra temp),
    # fused with the -9e15 fill.
    masked = jnp.where(adj_ref[...] != 0, e, jnp.float32(-9.0e15))

    # row-wise softmax statistics, all arithmetic in f32 (v5e has no bf16 VPU/EUP).
    m = jnp.max(masked, axis=1, keepdims=True)
    p = jnp.exp(masked - m)                               # unnormalized probabilities
    denom = jnp.sum(p, axis=1, keepdims=True)             # (TQ, 1)

    # Deferred normalization: matmul with the UNNORMALIZED bf16 probabilities (f32
    # accumulation on the MXU), then scale the (TQ, F_out) rows by 1/denom.  This
    # replaces a TQ*N multiply with a TQ*F_out multiply and drops one (TQ, N) temp.
    h_prime = jnp.dot(
        p.astype(jnp.bfloat16), wh_ref[...], preferred_element_type=jnp.float32
    )
    h_prime = h_prime * pl.reciprocal(denom, approx=True)

    # ReLU (concat=True path).
    out_ref[...] = jnp.maximum(h_prime, 0.0).astype(out_ref.dtype)


# --------------------------------------------------------------------------------------
# Wrapper
# --------------------------------------------------------------------------------------
def gat_forward(h, adj, W, a, *, block_rows=None):
    """h: (N, F_in) f32, adj: (N, N) (nonzero = edge; pass int8/bool to avoid an extra
    O(N^2) conversion pass), W: (F_in, F_out) f32, a: (2*F_out, 1) f32.
    Returns relu(softmax-attention @ (h @ W)) as (N, F_out) f32."""
    N, f_in = h.shape
    f_out = W.shape[1]

    gen = _tpu_generation()
    default_tq, vmem_limit = _tuning_for_generation(gen)
    tq = min(block_rows if block_rows is not None else default_tq, N)
    grid = (pl.cdiv(N, tq),)

    compiler_params = pltpu.CompilerParams(
        dimension_semantics=("parallel",),
        vmem_limit_bytes=vmem_limit,
    )

    # int8 adjacency: cuts the dominant O(N^2) HBM stream 4x vs f32.  Prefer to store
    # the adjacency as int8/bool persistently so this is a no-op / cheap 1-byte cast.
    if adj.dtype == jnp.int8:
        adj_i8 = adj
    elif adj.dtype == jnp.bool_:
        adj_i8 = adj.astype(jnp.int8)
    else:
        adj_i8 = (adj > 0).astype(jnp.int8)

    # [a1 a2] as a (F_out, 2) matrix so the per-node scalars are a single MXU matmul.
    a_mat = jnp.concatenate([a[:f_out, :], a[f_out:, :]], axis=1)   # (F_out, 2)

    # ---- pass 1: projection + attention scalars -------------------------------------
    # (For tiny N this could be plain XLA; kept as a Pallas kernel for a single code
    #  path — it is a negligible fraction of the O(N^2) pass-2 cost at any scale.)
    wh_bf16, s12 = pl.pallas_call(
        gat_project_kernel,
        out_shape=(
            jax.ShapeDtypeStruct((N, f_out), jnp.bfloat16),   # Wh (values), bf16
            jax.ShapeDtypeStruct((N, 2), jnp.float32),        # [s1, s2] per node
        ),
        grid_spec=pltpu.PrefetchScalarGridSpec(
            num_scalar_prefetch=0,
            grid=grid,
            in_specs=[
                pl.BlockSpec((tq, f_in), lambda i: (i, 0)),     # h row block
                pl.BlockSpec((f_in, f_out), lambda i: (0, 0)),  # W (resident)
                pl.BlockSpec((f_out, 2), lambda i: (0, 0)),     # [a1 a2] (resident)
            ],
            out_specs=(
                pl.BlockSpec((tq, f_out), lambda i: (i, 0)),
                pl.BlockSpec((tq, 2), lambda i: (i, 0)),
            ),
        ),
        compiler_params=compiler_params,
    )(h, W, a_mat)

    s1 = s12[:, 0:1]                  # (N, 1): row-side scalars, blocked per grid step
    s2 = s12[:, 1:2].reshape(1, N)    # (1, N): column-side scalars, lane-dense, resident

    # ---- pass 2: masked softmax attention + aggregation ------------------------------
    out = pl.pallas_call(
        gat_attention_kernel,
        out_shape=jax.ShapeDtypeStruct((N, f_out), jnp.float32),
        grid_spec=pltpu.PrefetchScalarGridSpec(
            num_scalar_prefetch=0,
            grid=grid,
            in_specs=[
                pl.BlockSpec((tq, N), lambda i: (i, 0)),        # adjacency row block (int8)
                pl.BlockSpec((tq, 1), lambda i: (i, 0)),        # s1 row block
                pl.BlockSpec((1, N), lambda i: (0, 0)),         # s2 row (resident)
                pl.BlockSpec((N, f_out), lambda i: (0, 0)),     # Wh values (resident)
            ],
            out_specs=pl.BlockSpec((tq, f_out), lambda i: (i, 0)),
        ),
        compiler_params=compiler_params,
    )(adj_i8, s1, s2, wh_bf16)

    return out


def xavier_uniform(key, shape, gain):
    fan_in, fan_out = shape[0], shape[1]
    limit = gain * jnp.sqrt(6.0 / (fan_in + fan_out))
    return jax.random.uniform(key, shape, jnp.float32, -limit, limit)


if __name__ == "__main__":
    # Small synthetic problem: N=256 nodes, in_features=64, out_features=128
    # (lane-dense output; on v6e/v7x the whole attention pass is a single tq=256 step,
    #  on v5e it is two tq=128 steps).
    N, F_IN, F_OUT = 256, 64, 128
    key = jax.random.PRNGKey(0)
    k_h, k_adj, k_w, k_a = jax.random.split(key, 4)

    h = jax.random.normal(k_h, (N, F_IN), dtype=jnp.float32)
    # random adjacency with self loops, stored as int8 (no per-call conversion pass)
    adj = jax.random.uniform(k_adj, (N, N)) > 0.5
    adj = jnp.logical_or(adj, jnp.eye(N, dtype=bool)).astype(jnp.int8)

    W = xavier_uniform(k_w, (F_IN, F_OUT), gain=1.414)
    a = xavier_uniform(k_a, (2 * F_OUT, 1), gain=1.414)

    out = gat_forward(h, adj, W, a)
    jax.block_until_ready(out)

    # pure-JAX f32 reference (module semantics, eval mode)
    wh = h @ W
    wh1 = wh @ a[:F_OUT, :]
    wh2 = wh @ a[F_OUT:, :]
    e = wh1 + wh2.T
    e = jnp.where(e > 0, e, 0.01 * e)
    att = jnp.where(adj > 0, e, -9.0e15)
    att = jax.nn.softmax(att, axis=1)
    ref = jnp.maximum(att @ wh, 0.0)

    # kernel uses bf16 MXU operands (f32 accumulation) + approx reciprocal -> relaxed tol
    max_err = jnp.max(jnp.abs(out - ref))
    assert jnp.allclose(out, ref, atol=5e-2, rtol=5e-2), (
        f"mismatch vs reference, max abs err={max_err}")

    print("KERNEL_OK")
</pallas_src>

<mosaic_0001>
module attributes {stable_mosaic.version = 11 : i64} {
  func.func @gat_project_kernel(%arg0: i32, %arg1: memref<256x64xf32, #tpu.memory_space<vmem>>, %arg2: memref<64x128xf32, #tpu.memory_space<vmem>>, %arg3: memref<128x2xf32, #tpu.memory_space<vmem>>, %arg4: memref<256x128xbf16, #tpu.memory_space<vmem>>, %arg5: memref<256x2xf32, #tpu.memory_space<vmem>>) attributes {dimension_semantics = [#tpu.dimension_semantics<parallel>], iteration_bounds = array<i64: 1>, scalar_prefetch = 0 : i64, scratch_operands = 0 : i64, tpu.core_type = #tpu.core_type<tc>, window_params = [{transform_indices = @transform_0, window_bounds = array<i64: 256, 64>}, {pipeline_mode = #tpu.pipeline_mode<synchronous>, transform_indices = @transform_1, window_bounds = array<i64: 64, 128>}, {pipeline_mode = #tpu.pipeline_mode<synchronous>, transform_indices = @transform_2, window_bounds = array<i64: 128, 2>}, {transform_indices = @transform_3, window_bounds = array<i64: 256, 128>}, {transform_indices = @transform_4, window_bounds = array<i64: 256, 2>}]} {
    %c0 = arith.constant 0 : index
    %c0_0 = arith.constant 0 : index
    %0 = vector.load %arg1[%c0, %c0_0] : memref<256x64xf32, #tpu.memory_space<vmem>>, vector<256x64xf32>
    %1 = arith.truncf %0 : vector<256x64xf32> to vector<256x64xbf16>
    %c0_1 = arith.constant 0 : index
    %c0_2 = arith.constant 0 : index
    %2 = vector.load %arg2[%c0_1, %c0_2] : memref<64x128xf32, #tpu.memory_space<vmem>>, vector<64x128xf32>
    %3 = arith.truncf %2 : vector<64x128xf32> to vector<64x128xbf16>
    %cst = arith.constant dense<0.000000e+00> : vector<256x128xf32>
    %4 = tpu.matmul %1, %3, %cst {dimension_numbers = #tpu.dot_dimension_numbers<[1], [0], [0], [1], [0, 0, 1, 1], [], []>} : vector<256x64xbf16>, vector<64x128xbf16>, vector<256x128xf32> -> vector<256x128xf32>
    %c0_3 = arith.constant 0 : index
    %c0_4 = arith.constant 0 : index
    %5 = vector.load %arg3[%c0_3, %c0_4] : memref<128x2xf32, #tpu.memory_space<vmem>>, vector<128x2xf32>
    %cst_5 = arith.constant dense<0.000000e+00> : vector<256x2xf32>
    %6 = tpu.matmul %4, %5, %cst_5 {dimension_numbers = #tpu.dot_dimension_numbers<[1], [0], [0], [1], [0, 0, 1, 1], [], []>} : vector<256x128xf32>, vector<128x2xf32>, vector<256x2xf32> -> vector<256x2xf32>
    %c0_6 = arith.constant 0 : index
    %c0_7 = arith.constant 0 : index
    %7 = vector.load %arg5[%c0_6, %c0_7] : memref<256x2xf32, #tpu.memory_space<vmem>>, vector<256x2xf32>
    tpu.vector_store %arg5[%c0_6, %c0_7], %6 {strides = array<i32>} : memref<256x2xf32, #tpu.memory_space<vmem>>, vector<256x2xf32>,
    %8 = arith.truncf %4 : vector<256x128xf32> to vector<256x128xbf16>
    %c0_8 = arith.constant 0 : index
    %c0_9 = arith.constant 0 : index
    %9 = vector.load %arg4[%c0_8, %c0_9] : memref<256x128xbf16, #tpu.memory_space<vmem>>, vector<256x128xbf16>
    tpu.vector_store %arg4[%c0_8, %c0_9], %8 {strides = array<i32>} : memref<256x128xbf16, #tpu.memory_space<vmem>>, vector<256x128xbf16>,
    return
  }
  func.func @transform_0(%arg0: i32) -> (i32, i32) {
    %c0_i32 = arith.constant 0 : i32
    %c0_i32_0 = arith.constant 0 : i32
    return %arg0, %c0_i32 : i32, i32
  }
  func.func @transform_1(%arg0: i32) -> (i32, i32) {
    %c0_i32 = arith.constant 0 : i32
    %c0_i32_0 = arith.constant 0 : i32
    %c0_i32_1 = arith.constant 0 : i32
    return %c0_i32, %c0_i32_0 : i32, i32
  }
  func.func @transform_2(%arg0: i32) -> (i32, i32) {
    %c0_i32 = arith.constant 0 : i32
    %c0_i32_0 = arith.constant 0 : i32
    %c0_i32_1 = arith.constant 0 : i32
    return %c0_i32, %c0_i32_0 : i32, i32
  }
  func.func @transform_3(%arg0: i32) -> (i32, i32) {
    %c0_i32 = arith.constant 0 : i32
    %c0_i32_0 = arith.constant 0 : i32
    return %arg0, %c0_i32 : i32, i32
  }
  func.func @transform_4(%arg0: i32) -> (i32, i32) {
    %c0_i32 = arith.constant 0 : i32
    %c0_i32_0 = arith.constant 0 : i32
    return %arg0, %c0_i32 : i32, i32
  }
}

</mosaic_0001>

<bundles_post_ra>
// kernel: tpu_custom_call.1
= control target key start
LH: loop header
LB: loop body
LE: loop exit
PB: predicated region body
PF: predicated region fallthrough
CT: control target
= control target key end

     0   :  { %s983_s0 = inlined_call_operand.vmem [shape: f32[256,64], index: 0, kind: input, shape index: {}]   ;;  %s984_s1 = inlined_call_operand.vmem [shape: f32[64,128], index: 1, kind: input, shape index: {}]   ;;  %s985_s2 = inlined_call_operand.vmem [shape: f32[128,2], index: 2, kind: input, shape index: {}]   ;;  %s986_s3 = inlined_call_operand.hbm [shape: bf16[256,128], index: 3, kind: output, shape index: {0}]   ;;  %s987_s4 = inlined_call_operand.vmem [shape: f32[256,2], index: 4, kind: output, shape index: {1}]  }
   0x1   :  { %v72_v0 = vld [vmem:[%s984_s1 + $0x30] sm:$0xff]  ;;  %v73_v1 = vld [vmem:[%s984_s1 + $0x38] sm:$0xff]  ;;  %v70_v2 = vld [vmem:[%s984_s1 + $0x20] sm:$0xff] }
   0x2   :  { %v77_v3 = vpack.c.bf16 %v73_v1, %v72_v0  ;;  %v71_v4 = vld [vmem:[%s984_s1 + $0x28] sm:$0xff]  ;;  %v68_v6 = vld [vmem:[%s984_s1 + $0x10] sm:$0xff]  ;;  %v69_v7 = vld [vmem:[%s984_s1 + $0x18] sm:$0xff] }
   0x3   :  { %v76_v5 = vpack.c.bf16 %v71_v4, %v70_v2 }
   0x4   :  { %131 = vmatpush.bf16.msra.mxu0 %v77_v3  ;;  %575 = vmatpush.bf16.msra.mxu3 %v77_v3 }
   0x5   :  { %10 = vsyncpa [#allocation3], 0  ;;  %v75_v8 = vpack.c.bf16 %v69_v7, %v68_v6  ;;  %v66_v9 = vld [vmem:[%s984_s1] sm:$0xff]  ;;  %v67_v10 = vld [vmem:[%s984_s1 + $0x8] sm:$0xff]  ;;  %vm78_vm0 = vcmask 523264   ;;  %vm345_vm1 = vcmask 15360  }
   0x6   :  { %v74_v11 = vpack.c.bf16 %v67_v10, %v66_v9  ;;  %v18_v12 = vld [vmem:[%s983_s0] sm:$0xff]  ;;  %v19_v13 = vld [vmem:[%s983_s0 + $0x8] sm:$0xff]  ;;  %v20_v15 = vld [vmem:[%s983_s0 + $0x10] sm:$0xff]  ;;  %s640_s17 = smov [#allocation2]   ;;  %s448_s19 = sshll.u32 %s986_s3, 4  ;;  %s449_s19 = int_to_ptr.hbm [resolvable:$true] %s448_s19 }
   0x7   :  { %v50_v14 = vpack.c.bf16 %v19_v13, %v18_v12  ;;  %v21_v16 = vld [vmem:[%s983_s0 + $0x18] sm:$0xff]  ;;  %v22_v18 = vld [vmem:[%s983_s0 + $0x20] sm:$0xff]  ;;  %v23_v19 = vld [vmem:[%s983_s0 + $0x28] sm:$0xff]  ;;  %s641_s20 = smov 64   ;;  %s642_s21 = smov 4  }
   0x8   :  { %132 = vmatpush.bf16.msra.mxu0 %v76_v5  ;;  %576 = vmatpush.bf16.msra.mxu3 %v76_v5  ;;  %v51_v17 = vpack.c.bf16 %v21_v16, %v20_v15  ;;  %v52_v20 = vpack.c.bf16 %v23_v19, %v22_v18  ;;  %v24_v21 = vld [vmem:[%s983_s0 + $0x30] sm:$0xff]  ;;  %v25_v22 = vld [vmem:[%s983_s0 + $0x38] sm:$0xff]  ;;  %v26_v25 = vld [vmem:[%s983_s0 + $0x40] sm:$0xff] }
   0x9   :  { %v53_v23 = vpack.c.bf16 %v25_v22, %v24_v21  ;;  %v231_v24 = vld [vmem:[%s985_s2 + $0x78] sm:$0xff]  ;;  %v27_v26 = vld [vmem:[%s983_s0 + $0x48] sm:$0xff]  ;;  %v230_v28 = vld [vmem:[%s985_s2 + $0x70] sm:$0xff] }
   0xa   :  { %232 = vmatpush.msra.mxu1 %v231_v24  ;;  %579 = vmatpush.msra.mxu2 %v231_v24  ;;  %v54_v27 = vpack.c.bf16 %v27_v26, %v26_v25  ;;  %v229_v29 = vld [vmem:[%s985_s2 + $0x68] sm:$0xff]  ;;  %v228_v30 = vld [vmem:[%s985_s2 + $0x60] sm:$0xff]  ;;  %v227_v31 = vld [vmem:[%s985_s2 + $0x58] sm:$0xff] }
   0xb   :  { %v226_v32 = vld [vmem:[%s985_s2 + $0x50] sm:$0xff]  ;;  %v225_v33 = vld [vmem:[%s985_s2 + $0x48] sm:$0xff]  ;;  %v29_v35 = vld [vmem:[%s983_s0 + $0x58] sm:$0xff] }
   0xc   :  { %133 = vmatpush.bf16.msra.mxu0 %v75_v8  ;;  %577 = vmatpush.bf16.msra.mxu3 %v75_v8  ;;  %v28_v34 = vld [vmem:[%s983_s0 + $0x50] sm:$0xff]  ;;  %v224_v36 = vld [vmem:[%s985_s2 + $0x40] sm:$0xff]  ;;  %v223_v38 = vld [vmem:[%s985_s2 + $0x38] sm:$0xff] }
   0xd   :  { %233 = vmatpush.msra.mxu1 %v230_v28  ;;  %581 = vmatpush.msra.mxu2 %v230_v28  ;;  %v55_v37 = vpack.c.bf16 %v29_v35, %v28_v34  ;;  %v36_v39 = vld [vmem:[%s983_s0 + $0x90] sm:$0xff]  ;;  %v37_v40 = vld [vmem:[%s983_s0 + $0x98] sm:$0xff]  ;;  %v221_v43 = vld [vmem:[%s985_s2 + $0x28] sm:$0xff] }
   0xe   :  { %v222_v41 = vld [vmem:[%s985_s2 + $0x30] sm:$0xff]  ;;  %v59_v42 = vpack.c.bf16 %v37_v40, %v36_v39  ;;  %v220_v44 = vld [vmem:[%s985_s2 + $0x20] sm:$0xff]  ;;  %v219_v45 = vld [vmem:[%s985_s2 + $0x18] sm:$0xff] }
   0xf   :  { %234 = vmatpush.msra.mxu1 %v229_v29  ;;  %583 = vmatpush.msra.mxu2 %v229_v29  ;;  %v218_v46 = vld [vmem:[%s985_s2 + $0x10] sm:$0xff]  ;;  %v217_v47 = vld [vmem:[%s985_s2 + $0x8] sm:$0xff]  ;;  %v30_v48 = vld [vmem:[%s983_s0 + $0x60] sm:$0xff] }
  0x10   :  { %134 = vmatpush.bf16.msra.mxu0 %v74_v11  ;;  %578 = vmatpush.bf16.msra.mxu3 %v74_v11  ;;  %v31_v49 = vld [vmem:[%s983_s0 + $0x68] sm:$0xff]  ;;  %v216_v51 = vld [vmem:[%s985_s2] sm:$0xff]  ;;  %v32_v55 = vld [vmem:[%s983_s0 + $0x70] sm:$0xff] }
  0x11   :  { %235 = vmatpush.msra.mxu1 %v228_v30  ;;  %585 = vmatpush.msra.mxu2 %v228_v30  ;;  %v56_v50 = vpack.c.bf16 %v31_v49, %v30_v48  ;;  %v38_v52 = vld [vmem:[%s983_s0 + $0xa0] sm:$0xff]  ;;  %v39_v53 = vld [vmem:[%s983_s0 + $0xa8] sm:$0xff]  ;;  %v33_v56 = vld [vmem:[%s983_s0 + $0x78] sm:$0xff] }
  0x12   :  { %v60_v54 = vpack.c.bf16 %v39_v53, %v38_v52  ;;  %v57_v57 = vpack.c.bf16 %v33_v56, %v32_v55  ;;  %v40_v58 = vld [vmem:[%s983_s0 + $0xb0] sm:$0xff]  ;;  %v41_v59 = vld [vmem:[%s983_s0 + $0xb8] sm:$0xff]  ;;  %v34_v61 = vld [vmem:[%s983_s0 + $0x80] sm:$0xff] }
  0x13   :  { %464 = vmatmul.msk.bf16.vlgmr.msra.gmra.mxu0 %vm78_vm0, %v50_v14  ;;  %236 = vmatpush.msra.mxu1 %v227_v31  ;;  %v61_v60 = vpack.c.bf16 %v41_v59, %v40_v58  ;;  %v35_v62 = vld [vmem:[%s983_s0 + $0x88] sm:$0xff]  ;;  %v42_v1 = vld [vmem:[%s983_s0 + $0xc0] sm:$0xff]  ;;  %v44_v7 = vld [vmem:[%s983_s0 + $0xd0] sm:$0xff] }
  0x14   :  { %580 = vmatpush.msrb.mxu3 %v231_v24  ;;  %587 = vmatpush.msra.mxu2 %v227_v31  ;;  %v58_v63 = vpack.c.bf16 %v35_v62, %v34_v61  ;;  %v43_v2 = vld [vmem:[%s983_s0 + $0xc8] sm:$0xff]  ;;  %v45_v8 = vld [vmem:[%s983_s0 + $0xd8] sm:$0xff]  ;;  %v46_v13 = vld [vmem:[%s983_s0 + $0xe0] sm:$0xff] }
  0x15   :  { %237 = vmatpush.msra.mxu1 %v226_v32  ;;  %473 = vmatmul.msk.bf16.vlgmr.msra.gmra.mxu3 %vm78_vm0, %v59_v42  ;;  %v62_v3 = vpack.c.bf16 %v43_v2, %v42_v1  ;;  %v63_v9 = vpack.c.bf16 %v45_v8, %v44_v7  ;;  %v47_v14 = vld [vmem:[%s983_s0 + $0xe8] sm:$0xff]  ;;  %v48_v19 = vld [vmem:[%s983_s0 + $0xf0] sm:$0xff] }
  0x16   :  { %582 = vmatpush.msrb.mxu3 %v230_v28  ;;  %589 = vmatpush.msra.mxu2 %v226_v32  ;;  %v64_v15 = vpack.c.bf16 %v47_v14, %v46_v13 }
  0x17   :  { %238 = vmatpush.msra.mxu1 %v225_v33 }
  0x18   :  { %584 = vmatpush.msrb.mxu3 %v229_v29  ;;  %591 = vmatpush.msra.mxu2 %v225_v33 }
  0x19   :  { %239 = vmatpush.msra.mxu1 %v224_v36 }
  0x1a   :  { %586 = vmatpush.msrb.mxu3 %v228_v30  ;;  %593 = vmatpush.msra.mxu2 %v224_v36 }
  0x1b   :  { %240 = vmatpush.msra.mxu1 %v223_v38 }
  0x1c   :  { %588 = vmatpush.msrb.mxu3 %v227_v31  ;;  %595 = vmatpush.msra.mxu2 %v223_v38 }
  0x1d   :  { %241 = vmatpush.msra.mxu1 %v222_v41 }
  0x1e   :  { %590 = vmatpush.msrb.mxu3 %v226_v32  ;;  %597 = vmatpush.msra.mxu2 %v222_v41 }
  0x1f   :  { %242 = vmatpush.msra.mxu1 %v221_v43 }
  0x20   :  { %592 = vmatpush.msrb.mxu3 %v225_v33  ;;  %599 = vmatpush.msra.mxu2 %v221_v43 }
  0x21   :  { %243 = vmatpush.msra.mxu1 %v220_v44 }
  0x22   :  { %594 = vmatpush.msrb.mxu3 %v224_v36  ;;  %601 = vmatpush.msra.mxu2 %v220_v44 }
  0x23   :  { %465 = vmatmul.msk.bf16.gmra.mxu0 %vm78_vm0, %v51_v17  ;;  %244 = vmatpush.msra.mxu1 %v219_v45 }
  0x24   :  { %596 = vmatpush.msrb.mxu3 %v223_v38  ;;  %603 = vmatpush.msra.mxu2 %v219_v45 }
  0x25   :  { %245 = vmatpush.msra.mxu1 %v218_v46  ;;  %474 = vmatmul.msk.bf16.gmra.mxu3 %vm78_vm0, %v60_v54 }
  0x26   :  { %598 = vmatpush.msrb.mxu3 %v222_v41  ;;  %605 = vmatpush.msra.mxu2 %v218_v46 }
  0x27   :  { %246 = vmatpush.msra.mxu1 %v217_v47 }
  0x28   :  { %600 = vmatpush.msrb.mxu3 %v221_v43  ;;  %607 = vmatpush.msra.mxu2 %v217_v47 }
  0x29   :  { %247 = vmatpush.msra.mxu1 %v216_v51 }
  0x2a   :  { %602 = vmatpush.msrb.mxu3 %v220_v44  ;;  %609 = vmatpush.msra.mxu2 %v216_v51 }
  0x2c   :  { %604 = vmatpush.msrb.mxu3 %v219_v45 }
  0x2e   :  { %606 = vmatpush.msrb.mxu3 %v218_v46 }
  0x30   :  { %608 = vmatpush.msrb.mxu3 %v217_v47 }
  0x32   :  { %610 = vmatpush.msrb.mxu3 %v216_v51 }
  0x33   :  { %466 = vmatmul.msk.bf16.gmra.mxu0 %vm78_vm0, %v52_v20  ;;  %v49_v20 = vld [vmem:[%s983_s0 + $0xf8] sm:$0xff]  ;;  %s446_s0 = sshll.u32 %s640_s17, 4  ;;  %s447_s0 = int_to_ptr.vmem [resolvable:$true] %s446_s0 }
  0x34   :  { %v65_v21 = vpack.c.bf16 %v49_v20, %v48_v19 }
  0x35   :  { %475 = vmatmul.msk.bf16.gmra.mxu3 %vm78_vm0, %v61_v60 }
  0x43   :  { %467 = vmatmul.msk.bf16.gmra.mxu0 %vm78_vm0, %v53_v23 }
  0x45   :  { %476 = vmatmul.msk.bf16.gmra.mxu3 %vm78_vm0, %v62_v3 }
  0x53   :  { %468 = vmatmul.msk.bf16.gmra.mxu0 %vm78_vm0, %v54_v27 }
  0x55   :  { %477 = vmatmul.msk.bf16.gmra.mxu3 %vm78_vm0, %v63_v9 }
  0x63   :  { %469 = vmatmul.msk.bf16.gmra.mxu0 %vm78_vm0, %v55_v37 }
  0x65   :  { %478 = vmatmul.msk.bf16.gmra.mxu3 %vm78_vm0, %v64_v15 }
  0x73   :  { %470 = vmatmul.msk.bf16.gmra.mxu0 %vm78_vm0, %v56_v50 }
  0x75   :  { %479 = vmatmul.msk.bf16.gmra.mxu3 %vm78_vm0, %v65_v21 }
  0x83   :  { %471 = vmatmul.msk.bf16.gmra.mxu0 %vm78_vm0, %v57_v57 }
  0x90   :  { %v136_v0 = vpop.f32.mrf.mxu0 }
  0x91   :  { %248 = vmatmul.f32.vlgmr.msra.gmra.mxu1 %v136_v0 }
  0x93   :  { %472 = vmatmul.msk.bf16.gmra.mxu0 %vm78_vm0, %v58_v63 }
  0x98   :  { %v138_v4 = vpop.f32.mrf.mxu0  ;;  %v181_v29 = vpop.f32.mrf.mxu3 }
  0x99   :  { %v483_v5 = vpack.c.bf16 %v138_v4, %v136_v0  ;;  %251 = vmatmul.f32.gmra.mxu1 %v138_v4 }
  0x9b   :  { %484 = vst [vmem:[#allocation2] sm:$0xff] %v483_v5  }
  0xa0   :  { %v141_v6 = vpop.f32.mrf.mxu0  ;;  %v183_v32 = vpop.f32.mrf.mxu3 }
  0xa1   :  { %254 = vmatmul.f32.gmra.mxu1 %v141_v6  ;;  %v528_v33 = vpack.c.bf16 %v183_v32, %v181_v29 }
  0xa3   :  { %568 = vst [vmem:[#allocation2 + $0x48] sm:$0xff] %v528_v33  }
  0xa8   :  { %v143_v10 = vpop.f32.mrf.mxu0  ;;  %v186_v35 = vpop.f32.mrf.mxu3 }
  0xa9   :  { %v488_v11 = vpack.c.bf16 %v143_v10, %v141_v6  ;;  %257 = vmatmul.f32.gmra.mxu1 %v143_v10 }
  0xab   :  { %560 = vst [vmem:[#allocation2 + $0x8] sm:$0xff] %v488_v11  }
  0xb0   :  { %v146_v12 = vpop.f32.mrf.mxu0  ;;  %v188_v38 = vpop.f32.mrf.mxu3 }
  0xb1   :  { %260 = vmatmul.f32.gmra.mxu1 %v146_v12  ;;  %v533_v39 = vpack.c.bf16 %v188_v38, %v186_v35 }
  0xb3   :  { %569 = vst [vmem:[#allocation2 + $0x50] sm:$0xff] %v533_v39  }
  0xb8   :  { %v148_v16 = vpop.f32.mrf.mxu0  ;;  %v191_v41 = vpop.f32.mrf.mxu3 }
  0xb9   :  { %v493_v17 = vpack.c.bf16 %v148_v16, %v146_v12  ;;  %263 = vmatmul.f32.gmra.mxu1 %v148_v16 }
  0xbb   :  { %561 = vst [vmem:[#allocation2 + $0x10] sm:$0xff] %v493_v17  }
  0xc0   :  { %v151_v18 = vpop.f32.mrf.mxu0  ;;  %v193_v45 = vpop.f32.mrf.mxu3 }
  0xc1   :  { %266 = vmatmul.f32.gmra.mxu1 %v151_v18  ;;  %v538_v46 = vpack.c.bf16 %v193_v45, %v191_v41 }
  0xc3   :  { %570 = vst [vmem:[#allocation2 + $0x58] sm:$0xff] %v538_v46  }
  0xc8   :  { %v153_v22 = vpop.f32.mrf.mxu0  ;;  %v196_v49 = vpop.f32.mrf.mxu3 }
  0xc9   :  { %v498_v23 = vpack.c.bf16 %v153_v22, %v151_v18  ;;  %269 = vmatmul.f32.gmra.mxu1 %v153_v22 }
  0xcb   :  { %562 = vst [vmem:[#allocation2 + $0x18] sm:$0xff] %v498_v23  }
  0xd0   :  { %v156_v24 = vpop.f32.mrf.mxu0  ;;  %v198_v52 = vpop.f32.mrf.mxu3 }
  0xd1   :  { %272 = vmatmul.f32.gmra.mxu1 %v156_v24  ;;  %v543_v53 = vpack.c.bf16 %v198_v52, %v196_v49 }
  0xd3   :  { %571 = vst [vmem:[#allocation2 + $0x60] sm:$0xff] %v543_v53  }
  0xd8   :  { %v158_v25 = vpop.f32.mrf.mxu0  ;;  %v201_v55 = vpop.f32.mrf.mxu3 }
  0xd9   :  { %v503_v26 = vpack.c.bf16 %v158_v25, %v156_v24  ;;  %275 = vmatmul.f32.gmra.mxu1 %v158_v25 }
  0xdb   :  { %563 = vst [vmem:[#allocation2 + $0x20] sm:$0xff] %v503_v26  }
  0xe0   :  { %v161_v27 = vpop.f32.mrf.mxu0  ;;  %v203_v57 = vpop.f32.mrf.mxu3 }
  0xe1   :  { %278 = vmatmul.f32.gmra.mxu1 %v161_v27  ;;  %v548_v58 = vpack.c.bf16 %v203_v57, %v201_v55 }
  0xe3   :  { %572 = vst [vmem:[#allocation2 + $0x68] sm:$0xff] %v548_v58  }
  0xe8   :  { %v163_v28 = vpop.f32.mrf.mxu0  ;;  %v206_v60 = vpop.f32.mrf.mxu3 }
  0xe9   :  { %v508_v30 = vpack.c.bf16 %v163_v28, %v161_v27  ;;  %281 = vmatmul.f32.gmra.mxu1 %v163_v28 }
  0xeb   :  { %564 = vst [vmem:[#allocation2 + $0x28] sm:$0xff] %v508_v30  }
  0xf0   :  { %v166_v31 = vpop.f32.mrf.mxu0  ;;  %v208_v62 = vpop.f32.mrf.mxu3 }
  0xf1   :  { %284 = vmatmul.f32.gmra.mxu1 %v166_v31  ;;  %v553_v63 = vpack.c.bf16 %v208_v62, %v206_v60 }
  0xf3   :  { %573 = vst [vmem:[#allocation2 + $0x70] sm:$0xff] %v553_v63  }
  0xf8   :  { %v168_v34 = vpop.f32.mrf.mxu0  ;;  %v211_v1 = vpop.f32.mrf.mxu3 }
  0xf9   :  { %v513_v36 = vpack.c.bf16 %v168_v34, %v166_v31  ;;  %287 = vmatmul.f32.gmra.mxu1 %v168_v34  ;;  %338 = vmatmul.f32.vlgmr.msrb.gmra.mxu3 %v211_v1 }
  0xfb   :  { %565 = vst [vmem:[#allocation2 + $0x30] sm:$0xff] %v513_v36  }
 0x100   :  { %v171_v37 = vpop.f32.mrf.mxu0  ;;  %v213_v3 = vpop.f32.mrf.mxu3 }
 0x101   :  { %290 = vmatmul.f32.gmra.mxu1 %v171_v37  ;;  %v558_v4 = vpack.c.bf16 %v213_v3, %v211_v1  ;;  %341 = vmatmul.f32.gmra.mxu3 %v213_v3 }
 0x103   :  { %574 = vst [vmem:[#allocation2 + $0x78] sm:$0xff] %v558_v4  }
 0x108   :  { %v173_v40 = vpop.f32.mrf.mxu0 }
 0x109   :  { %v518_v42 = vpack.c.bf16 %v173_v40, %v171_v37  ;;  %293 = vmatmul.f32.vlgmr.msra.gmra.mxu2 %v173_v40 }
 0x10b   :  { %566 = vst [vmem:[#allocation2 + $0x38] sm:$0xff] %v518_v42  }
 0x10e   :  { %v249_v43 = vpop.f32.mrf.mxu1 }
 0x10f   :  { %346 = vst.msk [vmem:[%s987_s4] sm:$0xff] %vm345_vm1, %v249_v43 }
 0x110   :  { %v176_v44 = vpop.f32.mrf.mxu0 }
 0x111   :  { %296 = vmatmul.f32.gmra.mxu2 %v176_v44 }
 0x116   :  { %v252_v47 = vpop.f32.mrf.mxu1 }
 0x117   :  { %347 = vst.msk [vmem:[%s987_s4 + $0x8] sm:$0xff] %vm345_vm1, %v252_v47 }
 0x118   :  { %v178_v48 = vpop.f32.mrf.mxu0 }
 0x119   :  { %v523_v50 = vpack.c.bf16 %v178_v48, %v176_v44  ;;  %299 = vmatmul.f32.gmra.mxu2 %v178_v48 }
 0x11b   :  { %567 = vst [vmem:[#allocation2 + $0x40] sm:$0xff] %v523_v50  }
 0x11c   :  { %454 = dma.vmem_to_hbm [thread:$0]  %s447_s0, 2048, %s449_s19, [#allocation3], %s641_s20, %s641_s20, %s642_s21  }
 0x11e   :  { %v255_v51 = vpop.f32.mrf.mxu1 }
 0x11f   :  { %348 = vst.msk [vmem:[%s987_s4 + $0x10] sm:$0xff] %vm345_vm1, %v255_v51 }
 0x121   :  { %302 = vmatmul.f32.gmra.mxu2 %v181_v29 }
 0x126   :  { %v258_v54 = vpop.f32.mrf.mxu1 }
 0x127   :  { %349 = vst.msk [vmem:[%s987_s4 + $0x18] sm:$0xff] %vm345_vm1, %v258_v54 }
 0x129   :  { %305 = vmatmul.f32.gmra.mxu2 %v183_v32 }
 0x12e   :  { %v261_v56 = vpop.f32.mrf.mxu1 }
 0x12f   :  { %350 = vst.msk [vmem:[%s987_s4 + $0x20] sm:$0xff] %vm345_vm1, %v261_v56 }
 0x131   :  { %308 = vmatmul.f32.gmra.mxu2 %v186_v35 }
 0x136   :  { %v264_v59 = vpop.f32.mrf.mxu1 }
 0x137   :  { %351 = vst.msk [vmem:[%s987_s4 + $0x28] sm:$0xff] %vm345_vm1, %v264_v59 }
 0x139   :  { %311 = vmatmul.f32.gmra.mxu2 %v188_v38 }
 0x13e   :  { %v267_v61 = vpop.f32.mrf.mxu1 }
 0x13f   :  { %352 = vst.msk [vmem:[%s987_s4 + $0x30] sm:$0xff] %vm345_vm1, %v267_v61 }
 0x141   :  { %314 = vmatmul.f32.gmra.mxu2 %v191_v41 }
 0x146   :  { %v270_v0 = vpop.f32.mrf.mxu1 }
 0x147   :  { %353 = vst.msk [vmem:[%s987_s4 + $0x38] sm:$0xff] %vm345_vm1, %v270_v0 }
 0x149   :  { %317 = vmatmul.f32.gmra.mxu2 %v193_v45 }
 0x14e   :  { %v273_v2 = vpop.f32.mrf.mxu1 }
 0x14f   :  { %354 = vst.msk [vmem:[%s987_s4 + $0x40] sm:$0xff] %vm345_vm1, %v273_v2 }
 0x151   :  { %320 = vmatmul.f32.gmra.mxu2 %v196_v49 }
 0x156   :  { %v276_v5 = vpop.f32.mrf.mxu1 }
 0x157   :  { %355 = vst.msk [vmem:[%s987_s4 + $0x48] sm:$0xff] %vm345_vm1, %v276_v5 }
 0x159   :  { %323 = vmatmul.f32.gmra.mxu2 %v198_v52 }
 0x15e   :  { %v279_v6 = vpop.f32.mrf.mxu1 }
 0x15f   :  { %356 = vst.msk [vmem:[%s987_s4 + $0x50] sm:$0xff] %vm345_vm1, %v279_v6 }
 0x161   :  { %326 = vmatmul.f32.gmra.mxu2 %v201_v55 }
 0x166   :  { %v282_v7 = vpop.f32.mrf.mxu1 }
 0x167   :  { %357 = vst.msk [vmem:[%s987_s4 + $0x58] sm:$0xff] %vm345_vm1, %v282_v7 }
 0x169   :  { %329 = vmatmul.f32.gmra.mxu2 %v203_v57 }
 0x16e   :  { %v285_v8 = vpop.f32.mrf.mxu1 }
 0x16f   :  { %358 = vst.msk [vmem:[%s987_s4 + $0x60] sm:$0xff] %vm345_vm1, %v285_v8 }
 0x171   :  { %332 = vmatmul.f32.gmra.mxu2 %v206_v60 }
 0x176   :  { %v288_v9 = vpop.f32.mrf.mxu1 }
 0x177   :  { %359 = vst.msk [vmem:[%s987_s4 + $0x68] sm:$0xff] %vm345_vm1, %v288_v9 }
 0x179   :  { %335 = vmatmul.f32.gmra.mxu2 %v208_v62 }
 0x17c   :  { %v339_v20 = vpop.f32.mrf.mxu3 }
 0x17d   :  { %376 = vst.msk [vmem:[%s987_s4 + $0xf0] sm:$0xff] %vm345_vm1, %v339_v20 }
 0x17e   :  { %v291_v10 = vpop.f32.mrf.mxu1 }
 0x17f   :  { %360 = vst.msk [vmem:[%s987_s4 + $0x70] sm:$0xff] %vm345_vm1, %v291_v10 }
 0x184   :  { %v342_v22 = vpop.f32.mrf.mxu3 }
 0x185   :  { %377 = vst.msk [vmem:[%s987_s4 + $0xf8] sm:$0xff] %vm345_vm1, %v342_v22 }
 0x18c   :  { %v294_v11 = vpop.f32.mrf.mxu2 }
 0x18d   :  { %361 = vst.msk [vmem:[%s987_s4 + $0x78] sm:$0xff] %vm345_vm1, %v294_v11 }
 0x194   :  { %v297_v12 = vpop.f32.mrf.mxu2 }
 0x195   :  { %362 = vst.msk [vmem:[%s987_s4 + $0x80] sm:$0xff] %vm345_vm1, %v297_v12 }
 0x19c   :  { %v300_v13 = vpop.f32.mrf.mxu2 }
 0x19d   :  { %363 = vst.msk [vmem:[%s987_s4 + $0x88] sm:$0xff] %vm345_vm1, %v300_v13 }
 0x1a4   :  { %v303_v14 = vpop.f32.mrf.mxu2 }
 0x1a5   :  { %364 = vst.msk [vmem:[%s987_s4 + $0x90] sm:$0xff] %vm345_vm1, %v303_v14 }
 0x1ac   :  { %v306_v15 = vpop.f32.mrf.mxu2 }
 0x1ad   :  { %365 = vst.msk [vmem:[%s987_s4 + $0x98] sm:$0xff] %vm345_vm1, %v306_v15 }
 0x1b4   :  { %v309_v16 = vpop.f32.mrf.mxu2 }
 0x1b5   :  { %366 = vst.msk [vmem:[%s987_s4 + $0xa0] sm:$0xff] %vm345_vm1, %v309_v16 }
 0x1bc   :  { %v312_v17 = vpop.f32.mrf.mxu2 }
 0x1bd   :  { %367 = vst.msk [vmem:[%s987_s4 + $0xa8] sm:$0xff] %vm345_vm1, %v312_v17 }
 0x1c4   :  { %v315_v18 = vpop.f32.mrf.mxu2 }
 0x1c5   :  { %368 = vst.msk [vmem:[%s987_s4 + $0xb0] sm:$0xff] %vm345_vm1, %v315_v18 }
 0x1cc   :  { %v318_v19 = vpop.f32.mrf.mxu2 }
 0x1cd   :  { %369 = vst.msk [vmem:[%s987_s4 + $0xb8] sm:$0xff] %vm345_vm1, %v318_v19 }
 0x1d4   :  { %v321_v21 = vpop.f32.mrf.mxu2 }
 0x1d5   :  { %370 = vst.msk [vmem:[%s987_s4 + $0xc0] sm:$0xff] %vm345_vm1, %v321_v21 }
 0x1dc   :  { %v324_v23 = vpop.f32.mrf.mxu2 }
 0x1dd   :  { %371 = vst.msk [vmem:[%s987_s4 + $0xc8] sm:$0xff] %vm345_vm1, %v324_v23 }
 0x1e4   :  { %v327_v24 = vpop.f32.mrf.mxu2 }
 0x1e5   :  { %372 = vst.msk [vmem:[%s987_s4 + $0xd0] sm:$0xff] %vm345_vm1, %v327_v24 }
 0x1ec   :  { %v330_v25 = vpop.f32.mrf.mxu2 }
 0x1ed   :  { %373 = vst.msk [vmem:[%s987_s4 + $0xd8] sm:$0xff] %vm345_vm1, %v330_v25 }
 0x1f4   :  { %v333_v26 = vpop.f32.mrf.mxu2 }
 0x1f5   :  { %374 = vst.msk [vmem:[%s987_s4 + $0xe0] sm:$0xff] %vm345_vm1, %v333_v26 }
 0x1fc   :  { %v336_v27 = vpop.f32.mrf.mxu2 }
 0x1fd   :  { %375 = vst.msk [vmem:[%s987_s4 + $0xe8] sm:$0xff] %vm345_vm1, %v336_v27 }
 0x1fe   :  { %638 = dma.done.wait [#allocation3], 2048  }
 0x1ff   :  { %639 = vsyncadd [#allocation3], 4294965248 }
 0x200   :  { %463 = vsyncpa [#allocation3], 1 }

</bundles_post_ra>
